<compile_context>
chip_gen: v6e
topology: v6e:2x2x1
jax: 0.10.0
libtpu: 0.0.40
codegen_flags: <defaults>
</compile_context>

<pallas_src>
import functools
import math

import numpy as np
import jax
import jax.numpy as jnp
from jax.experimental import pallas as pl
from jax.experimental.pallas import tpu as pltpu

_HALF_PI = float(np.pi / 2.0)


def _round_up(x: int, m: int) -> int:
    return ((x + m - 1) // m) * m


def _frequency_kernel(x_ref, rep_ref, o_ref, *, n_levels: int):
    # x_ref:   (tile_g, in_w)   VMEM — 8 original rows packed per group-row
    # rep_ref: (in_w, blk_w)    VMEM — bf16 one-hot replication matrix
    # o_ref:   (tile_g, blk_w)  VMEM — lane-dense output (blk_w % 128 == 0)
    two_l = 2 * n_levels
    blk_w = o_ref.shape[-1]

    x = x_ref[...].astype(jnp.float32)                 # (tile_g, in_w)

    # Exact bf16x3 split of x so the one-hot MXU replication preserves the full
    # f32 mantissa (the differences are exact by Sterbenz; 3 bf16 chunks cover
    # all 24 mantissa bits).
    x_hi = x.astype(jnp.bfloat16)
    r1 = x - x_hi.astype(jnp.float32)
    x_mid = r1.astype(jnp.bfloat16)
    x_lo = (r1 - x_mid.astype(jnp.float32)).astype(jnp.bfloat16)

    # Replicate each input lane across its 2L output lanes on the MXU (idle
    # otherwise): xb[g, j] = x[g, j // two_l].
    rep = rep_ref[...]                                 # (in_w, blk_w) bf16, {0,1}
    xb = jnp.dot(x_hi, rep, preferred_element_type=jnp.float32)
    xb += jnp.dot(x_mid, rep, preferred_element_type=jnp.float32)
    xb += jnp.dot(x_lo, rep, preferred_element_type=jnp.float32)  # (tile_g, blk_w)

    # Per-lane constants from the lane iota (compile-time constant bit math).
    lane = jax.lax.broadcasted_iota(jnp.int32, (1, blk_w), 1)
    if two_l & (two_l - 1) == 0:
        u = lane & (two_l - 1)          # position within one dim's [sin(L)|cos(L)]
    else:
        u = lane % two_l
    if n_levels & (n_levels - 1) == 0:
        level = u & (n_levels - 1)
    else:
        level = u % n_levels

    # freq = 2**level, built exactly with power-of-two factors (no transcendental).
    freq = jnp.full((1, blk_w), 1.0, dtype=jnp.float32)
    bit = 1
    while bit < n_levels:
        freq = jnp.where((level & bit) != 0, freq * float(2.0 ** bit), freq)
        bit <<= 1

    # Phase trick: cos(z) == sin(z + pi/2) -> a single sin per lane.
    phase = jnp.where(u < n_levels, 0.0, _HALF_PI).astype(jnp.float32)

    o_ref[...] = jnp.sin(xb * freq + phase).astype(o_ref.dtype)


def frequency(x: jax.Array, n_levels: int = 8, tile_g: int = 512) -> jax.Array:
    """Pallas implementation of Frequency.forward.  x: (..., dim)."""
    assert n_levels > 0
    orig_shape = x.shape
    dim = orig_shape[-1]
    two_l = 2 * n_levels
    out_w = dim * two_l

    # Group rpg consecutive rows so one group spans a 128-aligned lane slab:
    # (rpg rows) * out_w outputs == blk_w lanes with blk_w % 128 == 0.
    # For dim=3, L=8: rpg=8, in_w=24, blk_w=384 = 3*128.
    rpg = 128 // math.gcd(out_w, 128)
    in_w = rpg * dim
    blk_w = rpg * out_w

    x_flat = x.reshape(-1, dim)
    n_rows = x_flat.shape[0]
    n_groups = -(-n_rows // rpg)

    # Group tile: multiple of 8 sublanes; pad the group count to the tile.
    tile_g = _round_up(max(8, min(tile_g, _round_up(n_groups, 8))), 8)
    g_pad = _round_up(n_groups, tile_g)
    rows_pad = g_pad * rpg
    if rows_pad != n_rows:
        x_flat = jnp.pad(x_flat, ((0, rows_pad - n_rows), (0, 0)))
    x_g = x_flat.reshape(g_pad, in_w)                  # free row-major reshape

    # One-hot replication matrix: rep[k, j] = (j // two_l == k), exact in bf16.
    j_idx = np.arange(blk_w)
    rep_np = (j_idx[None, :] // two_l == np.arange(in_w)[:, None]).astype(np.float32)
    rep = jnp.asarray(rep_np, dtype=jnp.bfloat16)

    out = pl.pallas_call(
        functools.partial(_frequency_kernel, n_levels=n_levels),
        out_shape=jax.ShapeDtypeStruct((g_pad, blk_w), x.dtype),
        grid=(g_pad // tile_g,),
        in_specs=[
            pl.BlockSpec((tile_g, in_w), lambda i: (i, 0)),
            pl.BlockSpec((in_w, blk_w), lambda i: (0, 0)),
        ],
        out_specs=pl.BlockSpec((tile_g, blk_w), lambda i: (i, 0)),
        compiler_params=pltpu.CompilerParams(
            dimension_semantics=("parallel",),
        ),
    )(x_g, rep)

    out = out.reshape(rows_pad, out_w)[:n_rows]        # free reshape + row slice
    return out.reshape(*orig_shape[:-1], out_w)


def _frequency_ref(x: jax.Array, n_levels: int = 8) -> jax.Array:
    """Pure-JAX reference mirroring the PyTorch module."""
    freqs = jnp.asarray(
        np.power(2.0, np.linspace(0.0, n_levels - 1, n_levels)).astype(np.float32))
    xb = x[..., None].astype(jnp.float32) * freqs
    y = jnp.concatenate((jnp.sin(xb), jnp.cos(xb)), axis=-1)
    return y.reshape(*x.shape[:-1], x.shape[-1] * 2 * n_levels).astype(x.dtype)


if __name__ == "__main__":
    key = jax.random.PRNGKey(0)
    n_levels = 8

    # Shapes matching JointWiseEnhanceLayer.pos_encoding usage:
    # (B, num_joints=21, 3): uv-like values in [-1, 1] plus a confidence column.
    B, J, dim = 2, 21, 3
    k0, k1 = jax.random.split(key)
    x = jax.random.uniform(k0, (B, J, dim), dtype=jnp.float32, minval=-1.0, maxval=1.0)

    out = jax.block_until_ready(frequency(x, n_levels=n_levels))
    ref = _frequency_ref(x, n_levels=n_levels)
    assert out.shape == (B, J, dim * n_levels * 2), out.shape
    np.testing.assert_allclose(np.asarray(out), np.asarray(ref), rtol=1e-5, atol=2e-5)

    # Second case: row count not divisible by the group tile (exercises wrapper
    # padding and a multi-step "parallel" grid: 441 rows -> 56 groups, tile_g=8).
    x2 = jax.random.uniform(k1, (3, 7, J, dim), dtype=jnp.float32, minval=-1.0, maxval=1.0)
    out2 = jax.block_until_ready(frequency(x2, n_levels=n_levels, tile_g=8))
    ref2 = _frequency_ref(x2, n_levels=n_levels)
    assert out2.shape == (3, 7, J, dim * n_levels * 2), out2.shape
    np.testing.assert_allclose(np.asarray(out2), np.asarray(ref2), rtol=1e-5, atol=2e-5)

    print("KERNEL_OK")
</pallas_src>

<mosaic_0001>
module attributes {stable_mosaic.version = 11 : i64} {
  func.func @_frequency_kernel(%arg0: i32, %arg1: memref<8x24xf32, #tpu.memory_space<vmem>>, %arg2: memref<24x384xbf16, #tpu.memory_space<vmem>>, %arg3: memref<8x384xf32, #tpu.memory_space<vmem>>) attributes {dimension_semantics = [#tpu.dimension_semantics<parallel>], iteration_bounds = array<i64: 1>, scalar_prefetch = 0 : i64, scratch_operands = 0 : i64, tpu.core_type = #tpu.core_type<tc>, window_params = [{transform_indices = @transform_0, window_bounds = array<i64: 8, 24>}, {pipeline_mode = #tpu.pipeline_mode<synchronous>, transform_indices = @transform_1, window_bounds = array<i64: 24, 384>}, {transform_indices = @transform_2, window_bounds = array<i64: 8, 384>}]} {
    %c0 = arith.constant 0 : index
    %c0_0 = arith.constant 0 : index
    %0 = vector.load %arg1[%c0, %c0_0] : memref<8x24xf32, #tpu.memory_space<vmem>>, vector<8x24xf32>
    %1 = arith.truncf %0 : vector<8x24xf32> to vector<8x24xbf16>
    %2 = arith.extf %1 : vector<8x24xbf16> to vector<8x24xf32>
    %3 = arith.subf %0, %2 : vector<8x24xf32>
    %4 = arith.truncf %3 : vector<8x24xf32> to vector<8x24xbf16>
    %5 = arith.extf %4 : vector<8x24xbf16> to vector<8x24xf32>
    %6 = arith.subf %3, %5 : vector<8x24xf32>
    %7 = arith.truncf %6 : vector<8x24xf32> to vector<8x24xbf16>
    %c0_1 = arith.constant 0 : index
    %c0_2 = arith.constant 0 : index
    %8 = vector.load %arg2[%c0_1, %c0_2] : memref<24x384xbf16, #tpu.memory_space<vmem>>, vector<24x384xbf16>
    %cst = arith.constant dense<0.000000e+00> : vector<8x384xf32>
    %9 = tpu.matmul %1, %8, %cst {dimension_numbers = #tpu.dot_dimension_numbers<[1], [0], [0], [1], [0, 0, 1, 1], [], []>} : vector<8x24xbf16>, vector<24x384xbf16>, vector<8x384xf32> -> vector<8x384xf32>
    %cst_3 = arith.constant dense<0.000000e+00> : vector<8x384xf32>
    %10 = tpu.matmul %4, %8, %cst_3 {dimension_numbers = #tpu.dot_dimension_numbers<[1], [0], [0], [1], [0, 0, 1, 1], [], []>} : vector<8x24xbf16>, vector<24x384xbf16>, vector<8x384xf32> -> vector<8x384xf32>
    %11 = arith.addf %9, %10 : vector<8x384xf32>
    %cst_4 = arith.constant dense<0.000000e+00> : vector<8x384xf32>
    %12 = tpu.matmul %7, %8, %cst_4 {dimension_numbers = #tpu.dot_dimension_numbers<[1], [0], [0], [1], [0, 0, 1, 1], [], []>} : vector<8x24xbf16>, vector<24x384xbf16>, vector<8x384xf32> -> vector<8x384xf32>
    %13 = arith.addf %11, %12 : vector<8x384xf32>
    %14 = tpu.iota {dimensions = array<i32: 1>} : vector<1x384xi32>
    %c15_i32 = arith.constant 15 : i32
    %15 = vector.broadcast %c15_i32 : i32 to vector<1x384xi32>
    %16 = arith.andi %14, %15 : vector<1x384xi32>
    %c7_i32 = arith.constant 7 : i32
    %17 = vector.broadcast %c7_i32 : i32 to vector<1x384xi32>
    %18 = arith.andi %16, %17 : vector<1x384xi32>
    %cst_5 = arith.constant 1.000000e+00 : f32
    %19 = vector.broadcast %cst_5 : f32 to vector<1x384xf32>
    %c1_i32 = arith.constant 1 : i32
    %20 = vector.broadcast %c1_i32 : i32 to vector<1x384xi32>
    %21 = arith.andi %18, %20 : vector<1x384xi32>
    %c0_i32 = arith.constant 0 : i32
    %22 = vector.broadcast %c0_i32 : i32 to vector<1x384xi32>
    %23 = arith.cmpi ne, %21, %22 : vector<1x384xi32>
    %cst_6 = arith.constant 2.000000e+00 : f32
    %24 = vector.broadcast %cst_6 : f32 to vector<1x384xf32>
    %25 = arith.mulf %19, %24 : vector<1x384xf32>
    %26 = arith.select %23, %25, %19 : vector<1x384xi1>, vector<1x384xf32>
    %c2_i32 = arith.constant 2 : i32
    %27 = vector.broadcast %c2_i32 : i32 to vector<1x384xi32>
    %28 = arith.andi %18, %27 : vector<1x384xi32>
    %c0_i32_7 = arith.constant 0 : i32
    %29 = vector.broadcast %c0_i32_7 : i32 to vector<1x384xi32>
    %30 = arith.cmpi ne, %28, %29 : vector<1x384xi32>
    %cst_8 = arith.constant 4.000000e+00 : f32
    %31 = vector.broadcast %cst_8 : f32 to vector<1x384xf32>
    %32 = arith.mulf %26, %31 : vector<1x384xf32>
    %33 = arith.select %30, %32, %26 : vector<1x384xi1>, vector<1x384xf32>
    %c4_i32 = arith.constant 4 : i32
    %34 = vector.broadcast %c4_i32 : i32 to vector<1x384xi32>
    %35 = arith.andi %18, %34 : vector<1x384xi32>
    %c0_i32_9 = arith.constant 0 : i32
    %36 = vector.broadcast %c0_i32_9 : i32 to vector<1x384xi32>
    %37 = arith.cmpi ne, %35, %36 : vector<1x384xi32>
    %cst_10 = arith.constant 1.600000e+01 : f32
    %38 = vector.broadcast %cst_10 : f32 to vector<1x384xf32>
    %39 = arith.mulf %33, %38 : vector<1x384xf32>
    %40 = arith.select %37, %39, %33 : vector<1x384xi1>, vector<1x384xf32>
    %c8_i32 = arith.constant 8 : i32
    %41 = vector.broadcast %c8_i32 : i32 to vector<1x384xi32>
    %42 = arith.cmpi slt, %16, %41 : vector<1x384xi32>
    %cst_11 = arith.constant 0.000000e+00 : f32
    %cst_12 = arith.constant 1.57079637 : f32
    %43 = vector.broadcast %cst_11 : f32 to vector<1x384xf32>
    %44 = vector.broadcast %cst_12 : f32 to vector<1x384xf32>
    %45 = arith.select %42, %43, %44 : vector<1x384xi1>, vector<1x384xf32>
    %46 = vector.broadcast %40 : vector<1x384xf32> to vector<8x384xf32>
    %47 = arith.mulf %13, %46 : vector<8x384xf32>
    %48 = vector.broadcast %45 : vector<1x384xf32> to vector<8x384xf32>
    %49 = arith.addf %47, %48 : vector<8x384xf32>
    %50 = math.sin %49 : vector<8x384xf32>
    %c0_13 = arith.constant 0 : index
    %c0_14 = arith.constant 0 : index
    %51 = vector.load %arg3[%c0_13, %c0_14] : memref<8x384xf32, #tpu.memory_space<vmem>>, vector<8x384xf32>
    tpu.vector_store %arg3[%c0_13, %c0_14], %50 {strides = array<i32>} : memref<8x384xf32, #tpu.memory_space<vmem>>, vector<8x384xf32>,
    return
  }
  func.func @transform_0(%arg0: i32) -> (i32, i32) {
    %c0_i32 = arith.constant 0 : i32
    %c0_i32_0 = arith.constant 0 : i32
    return %arg0, %c0_i32 : i32, i32
  }
  func.func @transform_1(%arg0: i32) -> (i32, i32) {
    %c0_i32 = arith.constant 0 : i32
    %c0_i32_0 = arith.constant 0 : i32
    %c0_i32_1 = arith.constant 0 : i32
    return %c0_i32, %c0_i32_0 : i32, i32
  }
  func.func @transform_2(%arg0: i32) -> (i32, i32) {
    %c0_i32 = arith.constant 0 : i32
    %c0_i32_0 = arith.constant 0 : i32
    return %arg0, %c0_i32 : i32, i32
  }
}

</mosaic_0001>

<bundles_post_ra>
// kernel: tpu_custom_call.1
= control target key start
LH: loop header
LB: loop body
LE: loop exit
PB: predicated region body
PF: predicated region fallthrough
CT: control target
= control target key end

     0   :  { %7 = vsyncpa [#allocation3], 0  ;;  %s1181_s0 = inlined_call_operand.hbm [shape: f32[8,24], index: 0, kind: input, shape index: {}]   ;;  %s1182_s1 = inlined_call_operand.hbm [shape: bf16[24,384], index: 1, kind: input, shape index: {}]   ;;  %s1183_s2 = inlined_call_operand.hbm [shape: f32[8,384], index: 2, kind: output, shape index: {}]  }
   0x1   :  { %8 = vsyncpa [#allocation6], 0 }
   0x2   :  { %9 = vsyncpa [#allocation4], 0  ;;  %s902_s9 = smov [#allocation2]   ;;  %s903_s11 = smov [#allocation5]  }
   0x3   :  { %s16_s10 = sshll.u32 %s902_s9, 4  ;;  %s25_s12 = sshll.u32 %s903_s11, 4  ;;  %s17_s10 = int_to_ptr.vmem [resolvable:$true] %s16_s10  ;;  %s26_s12 = int_to_ptr.vmem [resolvable:$true] %s25_s12 }
   0x4   :  { %s844_s13 = scalar_lea.vmem %s17_s10, 128  ;;  %p849_p1 = scmp.lt.s32.totalorder %s17_s10, %s17_s10 }
   0x5   :  { %p845_p0 = scmp.ne.s32.totalorder %s17_s10, %s844_s13  ;;  %p850_p2 = scmp.lt.s32.totalorder %s844_s13, %s844_s13 }
   0x7   :  { %p851_p3 = por %p850_p2, %p849_p1 }
   0x9   :  { %p852_p4 = pnand %p851_p3, %p845_p0 }
   0xb   :  { %855 = shalt.err (!%p852_p4)
}
   0xc   :  { %19 = dma.hbm_to_vmem [thread:$0]  %s1181_s0, 128, %s17_s10, [#allocation3]  }
   0xd   :  { %s864_s16 = scalar_lea.vmem %s26_s12, 576  ;;  %p869_p6 = scmp.lt.s32.totalorder %s26_s12, %s26_s12 }
   0xe   :  { %p865_p5 = scmp.ne.s32.totalorder %s26_s12, %s864_s16  ;;  %p870_p7 = scmp.lt.s32.totalorder %s864_s16, %s864_s16 }
  0x10   :  { %p871_p8 = por %p870_p7, %p869_p6 }
  0x12   :  { %p872_p9 = pnand %p871_p8, %p865_p5 }
  0x14   :  { %875 = shalt.err (!%p872_p9)
}
  0x15   :  { %s904_s17 = smov 192   ;;  %s905_s18 = smov 12  }
  0x16   :  { %31 = dma.hbm_to_vmem [thread:$0]  %s1182_s1, 576, %s26_s12, [#allocation6], %s904_s17, %s904_s17, %s905_s18  }
  0x17   :  { %896 = dma.done.wait [#allocation3], 128  }
  0x18   :  { %897 = vsyncadd [#allocation3], 4294967168 }
  0x19   :  { %898 = dma.done.wait [#allocation6], 576  }
  0x1a   :  { %899 = vsyncadd [#allocation6], 4294966720  ;;  %v906_v0 = vmov 0.0   ;;  %v907_v1 = vmov 0   ;;  %vm908_vm0 = vmmov 0   ;;  %vm81_vm1 = vcmask 1043456  }
  0x1b   :  { %765 = vmatprep.subr.bf16.mxu1 %v906_v0  ;;  %123 = vmatprep.mubr.bf16.mxu0 %v907_v1  ;;  %v51_v2 = vld [vmem:[#allocation5 + $0x18] sm:$0xff]  ;;  %v819_v3 = vld [vmem:[#allocation5 + $0x20] ss:$0 sps:$4 sm:$0xff]   ;;  %v820_v6 = vld [vmem:[#allocation5 + $0x4] ss:$12 sps:$4 sm:$0xff]   ;;  %vm77_vm2 = vcmask 195584   ;;  %v343_v19 = vlaneseq }
  0x1c   :  { %769 = vmatprep.mubr.msk.bf16.mxu1 %vm908_vm0, %v906_v0  ;;  %v733_v4 = vcombine.high %v51_v2, %v51_v2  ;;  %v732_v5 = vcombine.low %v51_v2, %v51_v2  ;;  %v89_v7 = vsel %vm81_vm1, %v819_v3, 0  ;;  %v39_v8 = vld [vmem:[#allocation2] sm:$0xff]  ;;  %v823_v10 = vld [vmem:[#allocation5 + $0x8] ss:$12 sps:$4 sm:$0xff]   ;;  %v822_v12 = vld [vmem:[#allocation5] ss:$12 sps:$4 sm:$0xff]  }
  0x1d   :  { %766 = vmatpush3.bf16.msra.mxu1 %v89_v7  ;;  %v40_v11 = vpack.c.bf16 %v39_v8, %v39_v8  ;;  %v344_v20 = vand.u32 127, %v343_v19  ;;  %v909_v36 = vmov 1.0   ;;  %s917_s0 = smov [#allocation7]  }
  0x1e   :  { %735 = vmatprep.subr.msk.bf16.mxu0 %vm81_vm1, %v733_v4  ;;  %v83_v9 = vsel %vm81_vm1, %v732_v5, 0  ;;  %767 = vmatprep.subr.bf16.mxu1 %v906_v0  ;;  %s719_s1 = sshll.u32 %s917_s0, 4  ;;  %s720_s1 = int_to_ptr.vmem [resolvable:$true] %s719_s1 }
  0x1f   :  { %104 = vmatpush1.bf16.msra.mxu0 %v83_v9  ;;  %v41_v13 = vunpack.c.l.bf16 %v40_v11  ;;  %v346_v21 = vadd.s32 256, %v344_v20  ;;  %v953_v22 = vadd.s32 128, %v344_v20  ;;  %v347_v23 = vand.u32 15, %v344_v20  ;;  %s876_s21 = scalar_lea.vmem %s720_s1, 384  ;;  %p881_p11 = scmp.lt.s32.totalorder %s720_s1, %s720_s1 }
  0x20   :  { %105 = vmatprep.subr.bf16.mxu0 %v820_v6  ;;  %p877_p10 = scmp.ne.s32.totalorder %s720_s1, %s876_s21  ;;  %p882_p12 = scmp.lt.s32.totalorder %s876_s21, %s876_s21 }
  0x21   :  { %768 = vmatpush3.bf16.msra.mxu1 %v823_v10  ;;  %v42_v14 = vsub.f32 %v39_v8, %v41_v13  ;;  %v349_v24 = vand.u32 15, %v346_v21  ;;  %v348_v25 = vand.u32 15, %v953_v22  ;;  %v350_v26 = vand.u32 7, %v347_v23 }
  0x22   :  { %773 = vmatprep.subr.bf16.mxu1 %v906_v0  ;;  %vm386_vm11 = vcmp.lt.s32.totalorder %v347_v23, 8  ;;  %p883_p13 = por %p882_p12, %p881_p11 }
  0x23   :  { %106 = vmatpush1.bf16.msra.mxu0 %v822_v12  ;;  %v43_v15 = vpack.c.bf16 %v42_v14, %v42_v14  ;;  %v352_v27 = vand.u32 7, %v349_v24  ;;  %v351_v28 = vand.u32 7, %v348_v25  ;;  %v353_v29 = vand.u32 1, %v350_v26 }
  0x24   :  { %738 = vmatprep.subr.msk.bf16.mxu0 %vm81_vm1, %v733_v4  ;;  %v362_v38 = vand.u32 2, %v350_v26  ;;  %v374_v53 = vand.u32 4, %v350_v26  ;;  %vm388_vm12 = vcmp.lt.s32.totalorder %v349_v24, 8  ;;  %vm387_vm14 = vcmp.lt.s32.totalorder %v348_v25, 8  ;;  %p884_p0 = pnand %p883_p13, %p877_p10 }
  0x25   :  { %770 = vmatmul.mubr.msk.bf16.vlgmr.msra.gmra.mxu1 %vm77_vm2, %v43_v15  ;;  %v44_v16 = vunpack.c.l.bf16 %v43_v15  ;;  %v355_v30 = vand.u32 1, %v352_v27  ;;  %v354_v31 = vand.u32 1, %v351_v28  ;;  %vm356_vm3 = vcmp.ne.s32.totalorder %v353_v29, 0 }
  0x26   :  { %736 = vmatmul.mubr.msk.bf16.vlgmr.msra.gmra.mxu0 %vm77_vm2, %v43_v15  ;;  %774 = vmatpush3.bf16.msra.mxu1 %v89_v7  ;;  %v359_v37 = vsel %vm356_vm3, 2.0, %v909_v36  ;;  %v364_v40 = vand.u32 2, %v352_v27  ;;  %v363_v44 = vand.u32 2, %v351_v28  ;;  %vm365_vm6 = vcmp.ne.s32.totalorder %v362_v38, 0 }
  0x27   :  { %188 = vmatpush1.bf16.msra.mxu0 %v83_v9  ;;  %775 = vmatprep.subr.bf16.mxu1 %v906_v0  ;;  %v45_v17 = vsub.f32 %v42_v14, %v44_v16  ;;  %vm358_vm4 = vcmp.ne.s32.totalorder %v355_v30, 0  ;;  %vm357_vm5 = vcmp.ne.s32.totalorder %v354_v31, 0  ;;  %v368_v45 = vmul.f32 4.0, %v359_v37 }
  0x28   :  { %189 = vmatprep.subr.bf16.mxu0 %v820_v6  ;;  %207 = vmatprep.mubr.bf16.mxu0 %v907_v1  ;;  %v361_v39 = vsel %vm358_vm4, 2.0, %v909_v36  ;;  %v360_v43 = vsel %vm357_vm5, 2.0, %v909_v36  ;;  %vm367_vm7 = vcmp.ne.s32.totalorder %v364_v40, 0  ;;  %vm366_vm8 = vcmp.ne.s32.totalorder %v363_v44, 0 }
  0x29   :  { %777 = vmatprep.mubr.msk.bf16.mxu1 %vm908_vm0, %v906_v0  ;;  %v46_v18 = vpack.c.bf16 %v45_v17, %v45_v17  ;;  %v370_v46 = vmul.f32 4.0, %v361_v39  ;;  %v369_v49 = vmul.f32 4.0, %v360_v43  ;;  %v371_v52 = vsel %vm365_vm6, %v368_v45, %v359_v37 }
  0x2a   :  { %776 = vmatpush3.bf16.msra.mxu1 %v823_v10  ;;  %v376_v55 = vand.u32 4, %v352_v27  ;;  %v375_v59 = vand.u32 4, %v351_v28  ;;  %v380_v62 = vmul.f32 16.0, %v371_v52  ;;  %vm958_vm9 = vcmp.ne.s32.totalorder %v374_v53, 0 }
  0x2b   :  { %190 = vmatpush1.bf16.msra.mxu0 %v822_v12  ;;  %781 = vmatprep.subr.bf16.mxu1 %v906_v0  ;;  %v373_v54 = vsel %vm367_vm7, %v370_v46, %v361_v39  ;;  %v372_v58 = vsel %vm366_vm8, %v369_v49, %v360_v43  ;;  %v910_v15 = vmov 1.5707964  }
  0x2c   :  { %741 = vmatprep.subr.msk.bf16.mxu0 %vm81_vm1, %v733_v4  ;;  %v382_v63 = vmul.f32 16.0, %v373_v54  ;;  %vm962_vm10 = vcmp.ne.s32.totalorder %v376_v55, 0  ;;  %v381_v4 = vmul.f32 16.0, %v372_v58  ;;  %vm966_vm13 = vcmp.ne.s32.totalorder %v375_v59, 0 }
  0x2d   :  { %778 = vmatmul.mubr.msk.bf16.vlgmr.msra.gmra.mxu1 %vm77_vm2, %v40_v11  ;;  %v389_v16 = vsel %vm386_vm11, 0.0, %v910_v15  ;;  %v391_v17 = vsel %vm388_vm12, 0.0, %v910_v15  ;;  %v390_v30 = vsel %vm387_vm14, 0.0, %v910_v15 }
  0x2e   :  { %739 = vmatmul.mubr.msk.bf16.vlgmr.msra.gmra.mxu0 %vm77_vm2, %v40_v11  ;;  %782 = vmatpush3.bf16.msra.mxu1 %v89_v7  ;;  %v385_v11 = vsel %vm962_vm10, %v382_v63, %v373_v54  ;;  %v384_v19 = vsel %vm966_vm13, %v381_v4, %v372_v58  ;;  %v915_v7 = vmov 920167782  }
  0x2f   :  { %272 = vmatpush1.bf16.msra.mxu0 %v83_v9  ;;  %783 = vmatprep.subr.bf16.mxu1 %v906_v0  ;;  %v383_v9 = vsel %vm958_vm9, %v380_v62, %v371_v52  ;;  %v911_v62 = vmov 683565275  }
  0x30   :  { %273 = vmatprep.subr.bf16.mxu0 %v820_v6  ;;  %291 = vmatprep.mubr.bf16.mxu0 %v907_v1 }
  0x31   :  { %785 = vmatprep.mubr.msk.bf16.mxu1 %vm908_vm0, %v906_v0  ;;  %v912_v0 = vmov 2475754826  }
  0x32   :  { %784 = vmatpush3.bf16.msra.mxu1 %v823_v10 }
  0x33   :  { %274 = vmatpush1.bf16.msra.mxu0 %v822_v12 }
  0x35   :  { %786 = vmatmul.mubr.msk.bf16.vlgmr.msra.gmra.mxu1 %vm77_vm2, %v46_v18 }
  0x36   :  { %742 = vmatmul.mubr.msk.bf16.vlgmr.msra.gmra.mxu0 %vm77_vm2, %v46_v18 }
  0xe5   :  { %v166_v33 = vpop.f32.mrf.mxu1 }
  0xe6   :  { %v125_v32 = vpop.f32.mrf.mxu0 }
  0xe7   :  { %v771_v35 = vpop.f32.mrf.mxu1 }
  0xe8   :  { %v127_v34 = vpop.f32.mrf.mxu0 }
  0xe9   :  { %v169_v42 = vpop.f32.mrf.mxu1 }
  0xea   :  { %v129_v41 = vpop.f32.mrf.mxu0 }
  0xeb   :  { %v772_v48 = vpop.f32.mrf.mxu1 }
  0xec   :  { %v130_v47 = vpop.f32.mrf.mxu0 }
  0xed   :  { %v250_v51 = vpop.f32.mrf.mxu1 }
  0xee   :  { %v209_v50 = vpop.f32.mrf.mxu0  ;;  %v251_v6 = vadd.f32 %v250_v51, %v166_v33 }
  0xef   :  { %v779_v57 = vpop.f32.mrf.mxu1  ;;  %v210_v5 = vadd.f32 %v209_v50, %v125_v32 }
  0xf0   :  { %v211_v56 = vpop.f32.mrf.mxu0 }
  0xf1   :  { %v253_v61 = vpop.f32.mrf.mxu1  ;;  %v212_v12 = vadd.f32 %v211_v56, %v127_v34 }
  0xf2   :  { %v213_v60 = vpop.f32.mrf.mxu0 }
  0xf3   :  { %v780_v3 = vpop.f32.mrf.mxu1 }
  0xf4   :  { %v214_v2 = vpop.f32.mrf.mxu0  ;;  %v913_v3 = vmov 2131351028  }
  0xf5   :  { %v334_v10 = vpop.f32.mrf.mxu1 }
  0xf6   :  { %v293_v8 = vpop.f32.mrf.mxu0  ;;  %v342_v14 = vadd.f32 %v334_v10, %v251_v6 }
  0xf7   :  { %v340_v13 = vadd.f32 %v293_v8, %v210_v5  ;;  %v787_v20 = vpop.f32.mrf.mxu1  ;;  %v914_v5 = vmov 2102212464  }
  0xf8   :  { %v295_v18 = vpop.f32.mrf.mxu0  ;;  %v394_v23 = vmul.f32 %v385_v11, %v342_v14  ;;  %v916_v14 = vmov 1326507024  }
  0xf9   :  { %v392_v21 = vmul.f32 %v383_v9, %v340_v13  ;;  %v341_v24 = vadd.f32 %v295_v18, %v212_v12  ;;  %v337_v27 = vpop.f32.mrf.mxu1 }
  0xfa   :  { %v297_v26 = vpop.f32.mrf.mxu0  ;;  %v980_v29 = vadd.f32 %v394_v23, %v391_v17 }
  0xfb   :  { %v978_v28 = vadd.f32 %v392_v21, %v389_v16  ;;  %v393_v31 = vmul.f32 %v384_v19, %v341_v24  ;;  %v788_v33 = vpop.f32.mrf.mxu1 }
  0xfc   :  { %v298_v32 = vpop.f32.mrf.mxu0  ;;  %v606_v22 = vand.u32 2147483647, %v980_v29  ;;  %v609_v25 = vand.u32 2139095040, %v980_v29 }
  0xfd   :  { %v398_v34 = vand.u32 2147483647, %v978_v28  ;;  %v401_v35 = vand.u32 2139095040, %v978_v28  ;;  %v986_v36 = vadd.f32 %v393_v31, %v390_v30 }
  0xfe   :  { %v610_v39 = vshrl.u32 %v609_v25, 23  ;;  %v613_v40 = vand.u32 8388607, %v606_v22 }
  0xff   :  { %v402_v37 = vshrl.u32 %v401_v35, 23  ;;  %v405_v38 = vand.u32 8388607, %v398_v34  ;;  %v502_v41 = vand.u32 2147483647, %v986_v36  ;;  %v505_v42 = vand.u32 2139095040, %v986_v36 }
 0x100   :  { %v752_v44 = vadd.s32 4294967169, %v610_v39  ;;  %v614_v48 = vor.u32 8388608, %v613_v40 }
 0x101   :  { %v744_v43 = vadd.s32 4294967169, %v402_v37  ;;  %v506_v45 = vshrl.u32 %v505_v42, 23  ;;  %v406_v46 = vor.u32 8388608, %v405_v38  ;;  %v996_v51 = vand.u32 8388607, %v502_v41 }
 0x102   :  { %v616_v49 = vadd.s32 1, %v752_v44  ;;  %v1002_v58 = vshll.u32 %v614_v48, 8 }
 0x103   :  { %v408_v47 = vadd.s32 1, %v744_v43  ;;  %v748_v50 = vadd.s32 4294967169, %v506_v45  ;;  %v998_v55 = vshll.u32 %v406_v46, 8  ;;  %v510_v59 = vor.u32 8388608, %v996_v51 }
 0x104   :  { %vm617_vm0 = vcmp.gt.s32.totalorder %v616_v49, 0 }
 0x105   :  { %vm409_vm15 = vcmp.gt.s32.totalorder %v408_v47, 0  ;;  %v618_v56 = vsel %vm617_vm0, %v616_v49, 0  ;;  %v1005_v60 = vadd.s32 1, %v748_v50 }
 0x106   :  { %v410_v52 = vsel %vm409_vm15, %v408_v47, 0  ;;  %v1000_v57 = vshrl.u32 %v618_v56, 5  ;;  %v620_v2 = vand.u32 31, %v618_v56 }
 0x107   :  { %v411_v53 = vshrl.u32 %v410_v52, 5  ;;  %v412_v54 = vand.u32 31, %v410_v52  ;;  %vm513_vm5 = vcmp.gt.s32.totalorder %v1005_v60, 0 }
 0x108   :  { %v621_v19 = vsub.s32 32, %v620_v2  ;;  %v623_v23 = vshll.u32 %v911_v62, %v620_v2  ;;  %v626_v35 = vshll.u32 %v912_v0, %v620_v2  ;;  %v629_v52 = vshll.u32 %v913_v3, %v620_v2 }
 0x109   :  { %v413_v61 = vsub.s32 32, %v412_v54  ;;  %v415_v63 = vshll.u32 %v911_v62, %v412_v54  ;;  %v418_v1 = vshll.u32 %v912_v0, %v412_v54  ;;  %v421_v4 = vshll.u32 %v913_v3, %v412_v54 }
 0x10a   :  { %v424_v6 = vshll.u32 %v914_v5, %v412_v54  ;;  %v427_v8 = vshll.u32 %v915_v7, %v412_v54  ;;  %vm430_vm1 = vcmp.lt.s32.totalorder %v411_v53, 1  ;;  %vm431_vm2 = vcmp.lt.s32.totalorder %v411_v53, 2 }
 0x10b   :  { %v416_v9 = vshrl.u32 %v912_v0, %v413_v61  ;;  %v419_v10 = vshrl.u32 %v913_v3, %v413_v61  ;;  %v422_v11 = vshrl.u32 %v914_v5, %v413_v61  ;;  %v414_v12 = vshrl.u32 %v911_v62, %v413_v61 }
 0x10c   :  { %v425_v13 = vshrl.u32 %v915_v7, %v413_v61  ;;  %v428_v15 = vshrl.u32 %v916_v14, %v413_v61  ;;  %vm432_vm3 = vcmp.lt.s32.totalorder %v411_v53, 3  ;;  %vm433_vm4 = vcmp.lt.s32.totalorder %v411_v53, 4 }
 0x10d   :  { %v417_v16 = vor.u32 %v416_v9, %v415_v63  ;;  %v420_v17 = vor.u32 %v419_v10, %v418_v1  ;;  %v423_v18 = vor.u32 %v422_v11, %v421_v4  ;;  %v622_v38 = vshrl.u32 %v911_v62, %v621_v19 }
 0x10e   :  { %v426_v20 = vor.u32 %v425_v13, %v424_v6  ;;  %v429_v21 = vor.u32 %v428_v15, %v427_v8  ;;  %v624_v39 = vshrl.u32 %v912_v0, %v621_v19  ;;  %v627_v44 = vshrl.u32 %v913_v3, %v621_v19 }
 0x10f   :  { %v434_v24 = vsel %vm430_vm1, %v414_v12, %v417_v16  ;;  %v435_v26 = vsel %vm433_vm4, %v423_v18, 2102212464  ;;  %v438_v27 = vsel %vm430_vm1, %v417_v16, %v420_v17  ;;  %v442_v30 = vsel %vm430_vm1, %v420_v17, %v423_v18 }
 0x110   :  { %v436_v31 = vsel %vm432_vm3, %v420_v17, %v435_v26  ;;  %v439_v32 = vsel %vm433_vm4, %v426_v20, 920167782  ;;  %v443_v33 = vsel %vm433_vm4, %v429_v21, 1326507024  ;;  %v625_v49 = vor.u32 %v624_v39, %v623_v23 }
 0x111   :  { %v440_v25 = vsel %vm432_vm3, %v423_v18, %v439_v32  ;;  %v444_v37 = vsel %vm432_vm3, %v426_v20, %v443_v33  ;;  %v437_v40 = vsel %vm431_vm2, %v434_v24, %v436_v31  ;;  %v628_v50 = vor.u32 %v627_v44, %v626_v35 }
 0x112   :  { %v441_v42 = vsel %vm431_vm2, %v438_v27, %v440_v25  ;;  %v445_v43 = vsel %vm431_vm2, %v442_v30, %v444_v37  ;;  %v630_v54 = vshrl.u32 %v914_v5, %v621_v19  ;;  %v453_v53 = vmul.u32 %v998_v55, %v437_v40 }
 0x113   :  { %v1034_v45 = vmul.u32.u64.low %v998_v55, %v445_v43  ;;  %v1035_v46 = vmul.u32.u64.high %v998_v55, %v445_v43, %v1034_v45  ;;  %v1038_v47 = vmul.u32.u64.low %v998_v55, %v441_v42  ;;  %v1039_v48 = vmul.u32.u64.high %v998_v55, %v441_v42, %v1038_v47 }
 0x114   :  { %v632_v56 = vshll.u32 %v914_v5, %v620_v2  ;;  %v633_v61 = vshrl.u32 %v915_v7, %v621_v19  ;;  %v636_v63 = vshrl.u32 %v916_v14, %v621_v19  ;;  %v631_v1 = vor.u32 %v630_v54, %v629_v52 }
 0x115   :  { %v635_v4 = vshll.u32 %v915_v7, %v620_v2  ;;  %vm638_vm6 = vcmp.lt.s32.totalorder %v1000_v57, 1  ;;  %vm639_vm7 = vcmp.lt.s32.totalorder %v1000_v57, 2  ;;  %vm455_vm8 = vc.u32 %v1035_v46, %v1038_v47 }
 0x116   :  { %v456_v6 = vadd.s32 1, %v1039_v48  ;;  %v634_v8 = vor.u32 %v633_v61, %v632_v56  ;;  %vm640_vm9 = vcmp.lt.s32.totalorder %v1000_v57, 3  ;;  %vm641_vm10 = vcmp.lt.s32.totalorder %v1000_v57, 4 }
 0x117   :  { %v637_v55 = vor.u32 %v636_v63, %v635_v4  ;;  %v642_v9 = vsel %vm638_vm6, %v622_v38, %v625_v49  ;;  %v646_v10 = vsel %vm638_vm6, %v625_v49, %v628_v50  ;;  %v643_v2 = vsel %vm641_vm10, %v631_v1, 2102212464 }
 0x118   :  { %v457_v11 = vsel %vm455_vm8, %v456_v6, %v1039_v48  ;;  %v647_v12 = vsel %vm641_vm10, %v634_v8, 920167782  ;;  %v650_v13 = vsel %vm638_vm6, %v628_v50, %v631_v1  ;;  %v644_v16 = vsel %vm640_vm9, %v628_v50, %v643_v2 }
 0x119   :  { %v458_v15 = vadd.s32 %v457_v11, %v453_v53  ;;  %v648_v17 = vsel %vm640_vm9, %v631_v1, %v647_v12  ;;  %v651_v18 = vsel %vm641_vm10, %v637_v55, 1326507024  ;;  %v645_v19 = vsel %vm639_vm7, %v642_v9, %v644_v16 }
 0x11a   :  { %v649_v20 = vsel %vm639_vm7, %v646_v10, %v648_v17  ;;  %v652_v21 = vsel %vm640_vm9, %v634_v8, %v651_v18  ;;  %v514_v23 = vsel %vm513_vm5, %v1005_v60, 0  ;;  %v661_v37 = vmul.u32 %v1002_v58, %v645_v19 }
 0x11b   :  { %v459_v24 = vadd.s32 536870912, %v458_v15  ;;  %v653_v26 = vsel %vm639_vm7, %v650_v13, %v652_v21  ;;  %v1067_v27 = vmul.u32.u64.low %v1002_v58, %v649_v20  ;;  %v1068_v30 = vmul.u32.u64.high %v1002_v58, %v649_v20, %v1067_v27 }
 0x11c   :  { %v1072_v31 = vmul.u32.u64.low %v1002_v58, %v653_v26  ;;  %v1073_v32 = vmul.u32.u64.high %v1002_v58, %v653_v26, %v1072_v31  ;;  %v515_v33 = vshrl.u32 %v514_v23, 5  ;;  %v516_v25 = vand.u32 31, %v514_v23 }
 0x11d   :  { %v1075_v35 = vshrl.u32 %v459_v24, 30  ;;  %v1080_v60 = vshll.u32 %v510_v59, 8  ;;  %v664_v38 = vadd.s32 1, %v1068_v30  ;;  %v454_v31 = vadd.s32 %v1038_v47, %v1035_v46 }
 0x11e   :  { %v517_v39 = vsub.s32 32, %v516_v25  ;;  %vm534_vm11 = vcmp.lt.s32.totalorder %v515_v33, 1  ;;  %vm663_vm12 = vc.u32 %v1073_v32, %v1067_v27  ;;  %v519_v40 = vshll.u32 %v911_v62, %v516_v25 }
 0x11f   :  { %v461_v57 = vshll.u32 %v1075_v35, 30  ;;  %v522_v42 = vshll.u32 %v912_v0, %v516_v25  ;;  %vm535_vm13 = vcmp.lt.s32.totalorder %v515_v33, 2  ;;  %vm536_vm14 = vcmp.lt.s32.totalorder %v515_v33, 3 }
 0x120   :  { %v665_v51 = vsel %vm663_vm12, %v664_v38, %v1068_v30  ;;  %v520_v59 = vshrl.u32 %v912_v0, %v517_v39  ;;  %v525_v43 = vshll.u32 %v913_v3, %v516_v25  ;;  %v523_v45 = vshrl.u32 %v913_v3, %v517_v39 }
 0x121   :  { %v462_v58 = vsub.s32 %v458_v15, %v461_v57  ;;  %v666_v44 = vadd.s32 %v665_v51, %v661_v37  ;;  %v526_v48 = vshrl.u32 %v914_v5, %v517_v39  ;;  %v528_v49 = vshll.u32 %v914_v5, %v516_v25 }
 0x122   :  { %v521_v52 = vor.u32 %v520_v59, %v519_v40  ;;  %v529_v54 = vshrl.u32 %v915_v7, %v517_v39  ;;  %v531_v53 = vshll.u32 %v915_v7, %v516_v25  ;;  %v524_v61 = vor.u32 %v523_v45, %v522_v42 }
 0x123   :  { %v464_v50 = vsub.s32 0, %v462_v58  ;;  %v667_v56 = vadd.s32 536870912, %v666_v44  ;;  %v527_v63 = vor.u32 %v526_v48, %v525_v43  ;;  %v532_v0 = vshrl.u32 %v916_v14, %v517_v39 }
 0x124   :  { %v518_v4 = vshrl.u32 %v911_v62, %v517_v39  ;;  %v530_v6 = vor.u32 %v529_v54, %v528_v49  ;;  %vm537_vm15 = vcmp.lt.s32.totalorder %v515_v33, 4  ;;  %v542_v55 = vsel %vm534_vm11, %v521_v52, %v524_v61 }
 0x125   :  { %v745_v1 = vmin.u32 %v464_v50, %v462_v58  ;;  %v1098_v3 = vshrl.u32 %v667_v56, 30  ;;  %v533_v8 = vor.u32 %v532_v0, %v531_v53  ;;  %v539_v5 = vsel %vm537_vm15, %v527_v63, 2102212464 }
 0x126   :  { %v538_v10 = vsel %vm534_vm11, %v518_v4, %v521_v52  ;;  %v543_v7 = vsel %vm537_vm15, %v530_v6, 920167782  ;;  %v546_v11 = vsel %vm534_vm11, %v524_v61, %v527_v63  ;;  %v540_v14 = vsel %vm536_vm14, %v524_v61, %v539_v5 }
 0x127   :  { %v466_v9 = vclz %v745_v1  ;;  %v669_v2 = vshll.u32 %v1098_v3, 30  ;;  %v544_v62 = vsel %vm536_vm14, %v527_v63, %v543_v7  ;;  %v547_v12 = vsel %vm537_vm15, %v533_v8, 1326507024 }
 0x128   :  { %v545_v15 = vsel %vm535_vm13, %v542_v55, %v544_v62  ;;  %v548_v16 = vsel %vm536_vm14, %v530_v6, %v547_v12  ;;  %v541_v21 = vsel %vm535_vm13, %v538_v10, %v540_v14  ;;  %vm400_vm3 = vcmp.lt.s32.totalorder %v978_v28, 0 }
 0x129   :  { %v746_v13 = vadd.s32 4294967294, %v466_v9  ;;  %v670_v17 = vsub.s32 %v666_v44, %v669_v2  ;;  %v549_v18 = vsel %vm535_vm13, %v546_v11, %v548_v16  ;;  %v557_v38 = vmul.u32 %v1080_v60, %v541_v21 }
 0x12a   :  { %v1110_v19 = vmul.u32.u64.low %v1080_v60, %v545_v15  ;;  %v1111_v20 = vmul.u32.u64.high %v1080_v60, %v545_v15, %v1110_v19  ;;  %v1116_v23 = vmul.u32.u64.low %v1080_v60, %v549_v18  ;;  %v1117_v24 = vmul.u32.u64.high %v1080_v60, %v549_v18, %v1116_v23 }
 0x12b   :  { %vm747_vm0 = vcmp.lt.s32.totalorder %v746_v13, 0  ;;  %v672_v30 = vsub.s32 0, %v670_v17  ;;  %v484_v55 = vsub.s32 4, %v1075_v35  ;;  %vm1135_vm4 = vcmp.le.f32.partialorder %v398_v34, 0.7853982 }
 0x12c   :  { %v469_v26 = vsel %vm747_vm0, 0, %v746_v13  ;;  %v560_v39 = vadd.s32 1, %v1111_v20  ;;  %vm559_vm1 = vc.u32 %v1117_v24, %v1110_v19  ;;  %vm608_vm5 = vcmp.lt.s32.totalorder %v980_v29, 0 }
 0x12d   :  { %v470_v25 = vsub.s32 32, %v469_v26  ;;  %v474_v37 = vsub.s32 4294967266, %v469_v26  ;;  %v753_v57 = vmin.u32 %v672_v30, %v670_v17  ;;  %v471_v40 = vshll.u32 %v462_v58, %v469_v26 }
 0x12e   :  { %v561_v59 = vsel %vm559_vm1, %v560_v39, %v1111_v20  ;;  %v662_v58 = vadd.s32 %v1067_v27, %v1073_v32  ;;  %v485_v62 = vsel %vm400_vm3, %v484_v55, %v1075_v35  ;;  %vm1149_vm7 = vcmp.le.f32.partialorder %v606_v22, 0.7853982 }
 0x12f   :  { %v472_v42 = vshrl.u32 %v454_v31, %v470_v25  ;;  %v475_v33 = vadd.s32 127, %v474_v37  ;;  %v674_v51 = vclz %v753_v57  ;;  %v562_v45 = vadd.s32 %v561_v59, %v557_v38 }
 0x130   :  { %v487_v34 = vsel %vm1135_vm4, 0, %v485_v62  ;;  %v558_v23 = vadd.s32 %v1110_v19, %v1117_v24  ;;  %vm490_vm11 = vweird.f32 %v978_v28  ;;  %vm504_vm12 = vcmp.lt.s32.totalorder %v986_v36, 0 }
 0x131   :  { %v473_v43 = vor.u32 %v472_v42, %v471_v40  ;;  %v476_v44 = vshll.u32 %v475_v33, 23  ;;  %v754_v46 = vadd.s32 4294967294, %v674_v51  ;;  %v563_v48 = vadd.s32 536870912, %v562_v45 }
 0x132   :  { %v491_v21 = vadd.s32 3, %v487_v34  ;;  %vm1166_vm13 = vcmp.le.f32.partialorder %v502_v41, 0.7853982  ;;  %vm698_vm1 = vweird.f32 %v980_v29 }
 0x133   :  { %v477_v47 = vor.u32 4788187, %v476_v44  ;;  %vm755_vm2 = vcmp.lt.s32.totalorder %v754_v46, 0  ;;  %v480_v60 = vcvt.s32.f32 %v473_v43  ;;  %v1126_v52 = vshrl.u32 %v563_v48, 30 }
 0x134   :  { %v677_v50 = vsel %vm755_vm2, 0, %v754_v46  ;;  %v492_v22 = vand.u32 3, %v491_v21 }
 0x135   :  { %v478_v49 = vand.u32 2147483647, %v477_v47  ;;  %v678_v54 = vsub.s32 32, %v677_v50  ;;  %v682_v53 = vsub.s32 4294967266, %v677_v50  ;;  %v565_v61 = vshll.u32 %v1126_v52, 30 }
 0x136   :  { %v679_v63 = vshll.u32 %v670_v17, %v677_v50  ;;  %v692_v17 = vsub.s32 4, %v1098_v3  ;;  %vm497_vm8 = vcmp.eq.s32.totalorder %v492_v22, 2  ;;  %vm494_vm9 = vcmp.eq.s32.totalorder %v492_v22, 0 }
 0x137   :  { %v481_v56 = vmul.f32 %v480_v60, %v478_v49  ;;  %v680_v0 = vshrl.u32 %v662_v58, %v678_v54  ;;  %v683_v1 = vadd.s32 127, %v682_v53  ;;  %v566_v6 = vsub.s32 %v562_v45, %v565_v61 }
 0x138   :  { %v693_v25 = vsel %vm608_vm5, %v692_v17, %v1098_v3  ;;  %vm493_vm10 = vcmp.lt.s32.totalorder %v492_v22, 2  ;;  %v588_v58 = vsub.s32 4, %v1126_v52 }
 0x139   :  { %v482_v4 = vxor.u32 2147483648, %v481_v56  ;;  %v681_v8 = vor.u32 %v680_v0, %v679_v63  ;;  %v684_v5 = vshll.u32 %v683_v1, 23  ;;  %v568_v10 = vsub.s32 0, %v566_v6 }
 0x13a   :  { %v695_v42 = vsel %vm1149_vm7, 0, %v693_v25  ;;  %v589_v1 = vsel %vm504_vm12, %v588_v58, %v1126_v52 }
 0x13b   :  { %v483_v9 = vsel %vm400_vm3, %v482_v4, %v481_v56  ;;  %v685_v32 = vor.u32 4788187, %v684_v5  ;;  %v749_v11 = vmin.u32 %v568_v10, %v566_v6  ;;  %v688_v14 = vcvt.s32.f32 %v681_v8 }
 0x13c   :  { %v486_v7 = vsel %vm1135_vm4, %v978_v28, %v483_v9  ;;  %v699_v43 = vadd.s32 3, %v695_v42  ;;  %v591_v8 = vsel %vm1166_vm13, 0, %v589_v1 }
 0x13d   :  { %824 = vcosq.f32 %v486_v7  ;;  %v686_v2 = vand.u32 2147483647, %v685_v32  ;;  %v570_v12 = vclz %v749_v11  ;;  %v595_v55 = vadd.s32 3, %v591_v8 }
 0x13e   :  { %826 = vsinq.f32 %v486_v7  ;;  %v700_v50 = vand.u32 3, %v699_v43 }
 0x13f   :  { %v689_v13 = vmul.f32 %v688_v14, %v686_v2  ;;  %v750_v15 = vadd.s32 4294967294, %v570_v12  ;;  %v596_v9 = vand.u32 3, %v595_v55 }
 0x140   :  { %vm705_vm14 = vcmp.eq.s32.totalorder %v700_v50, 2  ;;  %vm702_vm15 = vcmp.eq.s32.totalorder %v700_v50, 0  ;;  %vm701_vm0 = vcmp.lt.s32.totalorder %v700_v50, 2 }
 0x141   :  { %v690_v16 = vxor.u32 2147483648, %v689_v13  ;;  %vm751_vm6 = vcmp.lt.s32.totalorder %v750_v15, 0  ;;  %vm601_vm2 = vcmp.eq.s32.totalorder %v596_v9, 2  ;;  %vm598_vm3 = vcmp.eq.s32.totalorder %v596_v9, 0 }
 0x142   :  { %v573_v20 = vsel %vm751_vm6, 0, %v750_v15  ;;  %vm597_vm4 = vcmp.lt.s32.totalorder %v596_v9, 2 }
 0x143   :  { %v691_v18 = vsel %vm608_vm5, %v690_v16, %v689_v13  ;;  %v574_v26 = vsub.s32 32, %v573_v20  ;;  %v578_v30 = vsub.s32 4294967266, %v573_v20  ;;  %v575_v37 = vshll.u32 %v566_v6, %v573_v20 }
 0x144   :  { %v694_v31 = vsel %vm1149_vm7, %v980_v29, %v691_v18  ;;  %vm594_vm5 = vweird.f32 %v986_v36 }
 0x145   :  { %828 = vcosq.f32 %v694_v31  ;;  %v576_v57 = vshrl.u32 %v558_v23, %v574_v26  ;;  %v579_v38 = vadd.s32 127, %v578_v30 }
 0x146   :  { %830 = vsinq.f32 %v694_v31 }
 0x147   :  { %v577_v39 = vor.u32 %v576_v57, %v575_v37  ;;  %v580_v40 = vshll.u32 %v579_v38, 23 }
 0x149   :  { %v581_v33 = vor.u32 4788187, %v580_v40  ;;  %v584_v3 = vcvt.s32.f32 %v577_v39 }
 0x14a   :  { %v825_v19 = vpop.eup %824 }
 0x14b   :  { %v827_v24 = vpop.eup %826  ;;  %v498_v51 = vxor.u32 2147483648, %v825_v19  ;;  %v582_v44 = vand.u32 2147483647, %v581_v33 }
 0x14c   :  { %v495_v59 = vxor.u32 2147483648, %v827_v24 }
 0x14d   :  { %v499_v45 = vsel %vm497_vm8, %v498_v51, %v827_v24  ;;  %v585_v47 = vmul.f32 %v584_v3, %v582_v44 }
 0x14e   :  { %v496_v46 = vsel %vm494_vm9, %v825_v19, %v495_v59 }
 0x14f   :  { %v500_v48 = vsel %vm493_vm10, %v496_v46, %v499_v45  ;;  %v586_v60 = vxor.u32 2147483648, %v585_v47 }
 0x150   :  { %v501_v49 = vsel %vm490_vm11, nan, %v500_v48 }
 0x151   :  { %710 = vst [vmem:[#allocation7] sm:$0xff] %v501_v49  ;;  %v587_v53 = vsel %vm504_vm12, %v586_v60, %v585_v47 }
 0x152   :  { %v829_v54 = vpop.eup %828  ;;  %v590_v28 = vsel %vm1166_vm13, %v986_v36, %v587_v53 }
 0x153   :  { %v831_v61 = vpop.eup %830  ;;  %v706_v63 = vxor.u32 2147483648, %v829_v54  ;;  %832 = vcosq.f32 %v590_v28 }
 0x154   :  { %v703_v0 = vxor.u32 2147483648, %v831_v61  ;;  %834 = vsinq.f32 %v590_v28 }
 0x155   :  { %v707_v4 = vsel %vm705_vm14, %v706_v63, %v831_v61 }
 0x156   :  { %v704_v6 = vsel %vm702_vm15, %v829_v54, %v703_v0 }
 0x157   :  { %v708_v41 = vsel %vm701_vm0, %v704_v6, %v707_v4 }
 0x158   :  { %v709_v5 = vsel %vm698_vm1, nan, %v708_v41 }
 0x159   :  { %712 = vst [vmem:[#allocation7 + $0x10] sm:$0xff] %v709_v5 }
 0x160   :  { %v833_v10 = vpop.eup %832 }
 0x161   :  { %v835_v27 = vpop.eup %834  ;;  %v602_v32 = vxor.u32 2147483648, %v833_v10 }
 0x162   :  { %v599_v7 = vxor.u32 2147483648, %v835_v27 }
 0x163   :  { %v603_v52 = vsel %vm601_vm2, %v602_v32, %v835_v27 }
 0x164   :  { %v600_v11 = vsel %vm598_vm3, %v833_v10, %v599_v7 }
 0x165   :  { %v604_v29 = vsel %vm597_vm4, %v600_v11, %v603_v52 }
 0x166   :  { %v605_v2 = vsel %vm594_vm5, nan, %v604_v29 }
 0x167   :  { %711 = vst [vmem:[#allocation7 + $0x8] sm:$0xff] %v605_v2 }
 0x168   :  { %887 = shalt.err (!%p884_p0)
}
 0x169   :  { %722 = dma.vmem_to_hbm [thread:$0]  %s720_s1, 384, %s1183_s2, [#allocation4]  }
 0x16a   :  { %900 = dma.done.wait [#allocation4], 384  }
 0x16b   :  { %901 = vsyncadd [#allocation4], 4294966912 }
 0x16c   :  { %726 = vsyncpa [#allocation3], 1 }
 0x16d   :  { %727 = vsyncpa [#allocation6], 1 }
 0x16e   :  { %728 = vsyncpa [#allocation4], 1 }

</bundles_post_ra>
